<compile_context>
chip_gen: v7x
topology: tpu7x:2x2x1
jax: 0.10.0
libtpu: 0.0.40
codegen_flags: <defaults>
</compile_context>

<pallas_src>
import functools

import jax
import jax.numpy as jnp
from jax.experimental import pallas as pl
from jax.experimental.pallas import tpu as pltpu


def mlp_kernel(x_ref,
               w1_ref, b1_ref,
               w2_ref, b2_ref,
               w3_ref, b3_ref,
               w4_ref, b4_ref,
               o_ref,
               *, bf16_epilogue):
    """Fused 4-layer MLP forward on one feature-major batch tile.

    Layout: activations are (features, batch_tile) with the batch on the
    128-lane axis; weights are PyTorch-native (out_features, in_features);
    every layer is h_next = W @ h (MXU, f32 accumulation).  Both the x input
    block and the output block are lane-dense.
    """

    def hidden(h, w_ref, b_ref):
        z = jnp.dot(w_ref[...], h, preferred_element_type=jnp.float32)
        if bf16_epilogue:
            # v6e/v7x: full-rate bf16 VALU -> bias + ReLU in bf16, feed the
            # next MXU directly (halves elementwise vregs + VMEM spills).
            z = z.astype(jnp.bfloat16) + b_ref[...].astype(jnp.bfloat16)
            return jnp.maximum(z, 0)
        # v5e: no bf16 VALU -> keep elementwise math in f32, cast only at the
        # MXU input of the next layer.
        z = z + b_ref[...]
        return jnp.maximum(z, 0.0).astype(jnp.bfloat16)

    h = hidden(x_ref[...], w1_ref, b1_ref)
    h = hidden(h, w2_ref, b2_ref)
    h = hidden(h, w3_ref, b3_ref)
    out = jnp.dot(w4_ref[...], h, preferred_element_type=jnp.float32)
    out = out + b4_ref[...]
    o_ref[...] = out.astype(o_ref.dtype)


def _chip_profile():
    """Per-generation knobs: tile cap, VMEM budget, epilogue dtype, TC split."""
    kind = ""
    try:
        kind = jax.devices()[0].device_kind.lower()
    except Exception:  # pragma: no cover - trace-time best effort
        pass
    if "v5" in kind:
        # v5e: 128 MiB VMEM, single TC, no bf16 VALU/EUP.
        return dict(tile_cap=16384, vmem_limit=96 * 1024 * 1024,
                    bf16_epilogue=False, two_core_split=False)
    if "v6" in kind:
        # v6e: 128 MiB VMEM, single TC, full-rate bf16 VALU.
        return dict(tile_cap=16384, vmem_limit=96 * 1024 * 1024,
                    bf16_epilogue=True, two_core_split=False)
    # v7x (2 TCs, 64 MiB VMEM/TC) and unknown chips: conservative VMEM budget.
    return dict(tile_cap=8192, vmem_limit=48 * 1024 * 1024,
                bf16_epilogue=True, two_core_split=True)


def _pick_batch_tile(batch, requested, cap, two_core_split):
    """Pick a large, 128-lane-aligned batch tile (batch lives on lanes)."""
    tile = max(1, min(requested, cap, batch))
    # Only split a grid of 1 into 2 when there is a second TensorCore to feed
    # (v7x) and each shard stays large; on single-TC chips it is pure overhead.
    if two_core_split and tile >= batch and batch >= 2048:
        tile = pl.cdiv(batch, 2)
    # Lane alignment (batch is the last / 128-lane block dim).
    tile = max(128, pl.cdiv(tile, 128) * 128)
    return tile


def mlp_forward(x, params, *, batch_tile=None):
    """x: [B, in_dim] f32.  params: list of (W[out,in] f32, b[out,1] f32).

    Returns [B, out_dim] f32, matching MLP(...)(x) with default hyperparams
    (layer_widths=[64,64,64], ReLU, no BN / dropout / spectral norm).
    """
    (w1, b1), (w2, b2), (w3, b3), (w4, b4) = params
    B, in_dim = x.shape
    out_dim = w4.shape[0]

    prof = _chip_profile()
    requested = batch_tile if batch_tile is not None else prof["tile_cap"]
    tile = _pick_batch_tile(B, requested, prof["tile_cap"],
                            prof["two_core_split"])
    grid_len = pl.cdiv(B, tile)
    b_pad = grid_len * tile

    # Feature-major (transposed) activations: the batch lives on the 128-lane
    # axis, so x / output blocks and the (64, tile) intermediates are all
    # lane-dense (no masked vst.msk partial stores, no 16-32x lane padding).
    xt = x.astype(jnp.bfloat16).T                      # (in_dim, B)
    if b_pad != B:
        # Pad the batch (lane) axis; padded columns only run ReLU(bias)
        # chains and are sliced off below.
        xt = jnp.pad(xt, ((0, 0), (0, b_pad - B)))

    # f32 master weights; cast to bf16 only at call time (grid-invariant).
    w1c, w2c, w3c, w4c = (w.astype(jnp.bfloat16) for w in (w1, w2, w3, w4))

    def full_spec(arr):
        return pl.BlockSpec(arr.shape, lambda i: (0, 0))

    flops = 2 * b_pad * (in_dim * w1.shape[0]
                         + w1.shape[0] * w2.shape[0]
                         + w2.shape[0] * w3.shape[0]
                         + w3.shape[0] * out_dim)
    bytes_accessed = int(xt.size) * 2 + b_pad * out_dim * 4 + sum(
        int(w.size) * 2 + int(b.size) * 4 for w, b in params)

    kernel = functools.partial(mlp_kernel,
                               bf16_epilogue=prof["bf16_epilogue"])

    out_t = pl.pallas_call(
        kernel,
        out_shape=jax.ShapeDtypeStruct((out_dim, b_pad), jnp.float32),
        grid_spec=pltpu.PrefetchScalarGridSpec(
            num_scalar_prefetch=0,
            grid=(grid_len,),
            in_specs=[
                pl.BlockSpec((in_dim, tile), lambda i: (0, i)),
                full_spec(w1c), full_spec(b1),
                full_spec(w2c), full_spec(b2),
                full_spec(w3c), full_spec(b3),
                full_spec(w4c), full_spec(b4),
            ],
            out_specs=pl.BlockSpec((out_dim, tile), lambda i: (0, i)),
        ),
        compiler_params=pltpu.CompilerParams(
            dimension_semantics=("parallel",),
            vmem_limit_bytes=prof["vmem_limit"],
        ),
        cost_estimate=pl.CostEstimate(flops=flops, transcendentals=0,
                                      bytes_accessed=bytes_accessed),
    )(xt, w1c, b1, w2c, b2, w3c, b3, w4c, b4)

    if b_pad != B:
        out_t = out_t[:, :B]
    return out_t.T                                      # (B, out_dim) f32


def init_mlp_params(key, in_dim, out_dim, layer_widths=(64, 64, 64)):
    """PyTorch nn.Linear init: U(-1/sqrt(fan_in), 1/sqrt(fan_in)).

    Weights are f32 masters in PyTorch-native (out_features, in_features)
    orientation; biases are (out_features, 1) f32 columns (feature-major).
    """
    params = []
    dims = [in_dim] + list(layer_widths) + [out_dim]
    for fan_in, fan_out in zip(dims[:-1], dims[1:]):
        key, kw, kb = jax.random.split(key, 3)
        bound = float(fan_in) ** -0.5
        w = jax.random.uniform(kw, (fan_out, fan_in), jnp.float32, -bound, bound)
        b = jax.random.uniform(kb, (fan_out, 1), jnp.float32, -bound, bound)
        params.append((w, b))
    return params


def mlp_reference(x, params, *, bf16_epilogue):
    """Pure-JAX reference with the same numeric recipe as the kernel."""
    h = x.astype(jnp.bfloat16).T                        # (in_dim, B)
    n = len(params)
    for i, (w, b) in enumerate(params):
        z = jnp.dot(w.astype(jnp.bfloat16), h,
                    preferred_element_type=jnp.float32)
        if i == n - 1:
            h = z + b
        elif bf16_epilogue:
            h = jnp.maximum(z.astype(jnp.bfloat16) + b.astype(jnp.bfloat16), 0)
        else:
            h = jnp.maximum(z + b, 0.0).astype(jnp.bfloat16)
    return h.T                                          # (B, out_dim) f32


if __name__ == "__main__":
    key = jax.random.PRNGKey(0)
    key, kx = jax.random.split(key)

    batch, in_dim, out_dim = 256, 8, 4
    x = jax.random.normal(kx, (batch, in_dim), jnp.float32)
    params = init_mlp_params(key, in_dim, out_dim, layer_widths=(64, 64, 64))

    fwd = jax.jit(mlp_forward)
    out = jax.block_until_ready(fwd(x, params))

    prof = _chip_profile()
    ref = mlp_reference(x, params, bf16_epilogue=prof["bf16_epilogue"])

    assert out.shape == (batch, out_dim), out.shape
    assert out.dtype == jnp.float32, out.dtype
    # bf16 MXU inputs / f32 accumulation on both sides -> tight agreement.
    assert jnp.allclose(out, ref, atol=1e-2, rtol=1e-2), \
        float(jnp.max(jnp.abs(out - ref)))

    print("KERNEL_OK")
</pallas_src>

<mosaic_0001>
module attributes {stable_mosaic.version = 11 : i64} {
  func.func @mlp_kernel(%arg0: i32, %arg1: memref<8x256xbf16, #tpu.memory_space<vmem>>, %arg2: memref<64x8xbf16, #tpu.memory_space<vmem>>, %arg3: memref<64x1xf32, #tpu.memory_space<vmem>>, %arg4: memref<64x64xbf16, #tpu.memory_space<vmem>>, %arg5: memref<64x1xf32, #tpu.memory_space<vmem>>, %arg6: memref<64x64xbf16, #tpu.memory_space<vmem>>, %arg7: memref<64x1xf32, #tpu.memory_space<vmem>>, %arg8: memref<4x64xbf16, #tpu.memory_space<vmem>>, %arg9: memref<4x1xf32, #tpu.memory_space<vmem>>, %arg10: memref<4x256xf32, #tpu.memory_space<vmem>>) attributes {dimension_semantics = [#tpu.dimension_semantics<parallel>], iteration_bounds = array<i64: 1>, scalar_prefetch = 0 : i64, scratch_operands = 0 : i64, tpu.core_type = #tpu.core_type<tc>, window_params = [{transform_indices = @transform_0, window_bounds = array<i64: 8, 256>}, {pipeline_mode = #tpu.pipeline_mode<synchronous>, transform_indices = @transform_1, window_bounds = array<i64: 64, 8>}, {pipeline_mode = #tpu.pipeline_mode<synchronous>, transform_indices = @transform_2, window_bounds = array<i64: 64, 1>}, {pipeline_mode = #tpu.pipeline_mode<synchronous>, transform_indices = @transform_3, window_bounds = array<i64: 64, 64>}, {pipeline_mode = #tpu.pipeline_mode<synchronous>, transform_indices = @transform_4, window_bounds = array<i64: 64, 1>}, {pipeline_mode = #tpu.pipeline_mode<synchronous>, transform_indices = @transform_5, window_bounds = array<i64: 64, 64>}, {pipeline_mode = #tpu.pipeline_mode<synchronous>, transform_indices = @transform_6, window_bounds = array<i64: 64, 1>}, {pipeline_mode = #tpu.pipeline_mode<synchronous>, transform_indices = @transform_7, window_bounds = array<i64: 4, 64>}, {pipeline_mode = #tpu.pipeline_mode<synchronous>, transform_indices = @transform_8, window_bounds = array<i64: 4, 1>}, {transform_indices = @transform_9, window_bounds = array<i64: 4, 256>}]} {
    %c0 = arith.constant 0 : index
    %c0_0 = arith.constant 0 : index
    %0 = vector.load %arg1[%c0, %c0_0] : memref<8x256xbf16, #tpu.memory_space<vmem>>, vector<8x256xbf16>
    %c0_1 = arith.constant 0 : index
    %c0_2 = arith.constant 0 : index
    %1 = vector.load %arg2[%c0_1, %c0_2] : memref<64x8xbf16, #tpu.memory_space<vmem>>, vector<64x8xbf16>
    %cst = arith.constant dense<0.000000e+00> : vector<64x256xf32>
    %2 = tpu.matmul %1, %0, %cst {dimension_numbers = #tpu.dot_dimension_numbers<[1], [0], [0], [1], [0, 0, 1, 1], [], []>} : vector<64x8xbf16>, vector<8x256xbf16>, vector<64x256xf32> -> vector<64x256xf32>
    %3 = arith.truncf %2 : vector<64x256xf32> to vector<64x256xbf16>
    %c0_3 = arith.constant 0 : index
    %c0_4 = arith.constant 0 : index
    %4 = vector.load %arg3[%c0_3, %c0_4] : memref<64x1xf32, #tpu.memory_space<vmem>>, vector<64x1xf32>
    %5 = arith.truncf %4 : vector<64x1xf32> to vector<64x1xbf16>
    %6 = vector.broadcast %5 : vector<64x1xbf16> to vector<64x256xbf16>
    %7 = arith.addf %3, %6 : vector<64x256xbf16>
    %cst_5 = arith.constant 0.000000e+00 : bf16
    %8 = vector.broadcast %cst_5 : bf16 to vector<64x256xbf16>
    %9 = arith.maximumf %7, %8 : vector<64x256xbf16>
    %c0_6 = arith.constant 0 : index
    %c0_7 = arith.constant 0 : index
    %10 = vector.load %arg4[%c0_6, %c0_7] : memref<64x64xbf16, #tpu.memory_space<vmem>>, vector<64x64xbf16>
    %cst_8 = arith.constant dense<0.000000e+00> : vector<64x256xf32>
    %11 = tpu.matmul %10, %9, %cst_8 {dimension_numbers = #tpu.dot_dimension_numbers<[1], [0], [0], [1], [0, 0, 1, 1], [], []>} : vector<64x64xbf16>, vector<64x256xbf16>, vector<64x256xf32> -> vector<64x256xf32>
    %12 = arith.truncf %11 : vector<64x256xf32> to vector<64x256xbf16>
    %c0_9 = arith.constant 0 : index
    %c0_10 = arith.constant 0 : index
    %13 = vector.load %arg5[%c0_9, %c0_10] : memref<64x1xf32, #tpu.memory_space<vmem>>, vector<64x1xf32>
    %14 = arith.truncf %13 : vector<64x1xf32> to vector<64x1xbf16>
    %15 = vector.broadcast %14 : vector<64x1xbf16> to vector<64x256xbf16>
    %16 = arith.addf %12, %15 : vector<64x256xbf16>
    %cst_11 = arith.constant 0.000000e+00 : bf16
    %17 = vector.broadcast %cst_11 : bf16 to vector<64x256xbf16>
    %18 = arith.maximumf %16, %17 : vector<64x256xbf16>
    %c0_12 = arith.constant 0 : index
    %c0_13 = arith.constant 0 : index
    %19 = vector.load %arg6[%c0_12, %c0_13] : memref<64x64xbf16, #tpu.memory_space<vmem>>, vector<64x64xbf16>
    %cst_14 = arith.constant dense<0.000000e+00> : vector<64x256xf32>
    %20 = tpu.matmul %19, %18, %cst_14 {dimension_numbers = #tpu.dot_dimension_numbers<[1], [0], [0], [1], [0, 0, 1, 1], [], []>} : vector<64x64xbf16>, vector<64x256xbf16>, vector<64x256xf32> -> vector<64x256xf32>
    %21 = arith.truncf %20 : vector<64x256xf32> to vector<64x256xbf16>
    %c0_15 = arith.constant 0 : index
    %c0_16 = arith.constant 0 : index
    %22 = vector.load %arg7[%c0_15, %c0_16] : memref<64x1xf32, #tpu.memory_space<vmem>>, vector<64x1xf32>
    %23 = arith.truncf %22 : vector<64x1xf32> to vector<64x1xbf16>
    %24 = vector.broadcast %23 : vector<64x1xbf16> to vector<64x256xbf16>
    %25 = arith.addf %21, %24 : vector<64x256xbf16>
    %cst_17 = arith.constant 0.000000e+00 : bf16
    %26 = vector.broadcast %cst_17 : bf16 to vector<64x256xbf16>
    %27 = arith.maximumf %25, %26 : vector<64x256xbf16>
    %c0_18 = arith.constant 0 : index
    %c0_19 = arith.constant 0 : index
    %28 = vector.load %arg8[%c0_18, %c0_19] : memref<4x64xbf16, #tpu.memory_space<vmem>>, vector<4x64xbf16>
    %cst_20 = arith.constant dense<0.000000e+00> : vector<4x256xf32>
    %29 = tpu.matmul %28, %27, %cst_20 {dimension_numbers = #tpu.dot_dimension_numbers<[1], [0], [0], [1], [0, 0, 1, 1], [], []>} : vector<4x64xbf16>, vector<64x256xbf16>, vector<4x256xf32> -> vector<4x256xf32>
    %c0_21 = arith.constant 0 : index
    %c0_22 = arith.constant 0 : index
    %30 = vector.load %arg9[%c0_21, %c0_22] : memref<4x1xf32, #tpu.memory_space<vmem>>, vector<4x1xf32>
    %31 = vector.broadcast %30 : vector<4x1xf32> to vector<4x256xf32>
    %32 = arith.addf %29, %31 : vector<4x256xf32>
    %c0_23 = arith.constant 0 : index
    %c0_24 = arith.constant 0 : index
    %33 = vector.load %arg10[%c0_23, %c0_24] : memref<4x256xf32, #tpu.memory_space<vmem>>, vector<4x256xf32>
    tpu.vector_store %arg10[%c0_23, %c0_24], %32 {strides = array<i32>} : memref<4x256xf32, #tpu.memory_space<vmem>>, vector<4x256xf32>,
    return
  }
  func.func @transform_0(%arg0: i32) -> (i32, i32) {
    %c0_i32 = arith.constant 0 : i32
    %c0_i32_0 = arith.constant 0 : i32
    return %c0_i32, %arg0 : i32, i32
  }
  func.func @transform_1(%arg0: i32) -> (i32, i32) {
    %c0_i32 = arith.constant 0 : i32
    %c0_i32_0 = arith.constant 0 : i32
    %c0_i32_1 = arith.constant 0 : i32
    return %c0_i32, %c0_i32_0 : i32, i32
  }
  func.func @transform_2(%arg0: i32) -> (i32, i32) {
    %c0_i32 = arith.constant 0 : i32
    %c0_i32_0 = arith.constant 0 : i32
    %c0_i32_1 = arith.constant 0 : i32
    return %c0_i32, %c0_i32_0 : i32, i32
  }
  func.func @transform_3(%arg0: i32) -> (i32, i32) {
    %c0_i32 = arith.constant 0 : i32
    %c0_i32_0 = arith.constant 0 : i32
    %c0_i32_1 = arith.constant 0 : i32
    return %c0_i32, %c0_i32_0 : i32, i32
  }
  func.func @transform_4(%arg0: i32) -> (i32, i32) {
    %c0_i32 = arith.constant 0 : i32
    %c0_i32_0 = arith.constant 0 : i32
    %c0_i32_1 = arith.constant 0 : i32
    return %c0_i32, %c0_i32_0 : i32, i32
  }
  func.func @transform_5(%arg0: i32) -> (i32, i32) {
    %c0_i32 = arith.constant 0 : i32
    %c0_i32_0 = arith.constant 0 : i32
    %c0_i32_1 = arith.constant 0 : i32
    return %c0_i32, %c0_i32_0 : i32, i32
  }
  func.func @transform_6(%arg0: i32) -> (i32, i32) {
    %c0_i32 = arith.constant 0 : i32
    %c0_i32_0 = arith.constant 0 : i32
    %c0_i32_1 = arith.constant 0 : i32
    return %c0_i32, %c0_i32_0 : i32, i32
  }
  func.func @transform_7(%arg0: i32) -> (i32, i32) {
    %c0_i32 = arith.constant 0 : i32
    %c0_i32_0 = arith.constant 0 : i32
    %c0_i32_1 = arith.constant 0 : i32
    return %c0_i32, %c0_i32_0 : i32, i32
  }
  func.func @transform_8(%arg0: i32) -> (i32, i32) {
    %c0_i32 = arith.constant 0 : i32
    %c0_i32_0 = arith.constant 0 : i32
    %c0_i32_1 = arith.constant 0 : i32
    return %c0_i32, %c0_i32_0 : i32, i32
  }
  func.func @transform_9(%arg0: i32) -> (i32, i32) {
    %c0_i32 = arith.constant 0 : i32
    %c0_i32_0 = arith.constant 0 : i32
    return %c0_i32, %arg0 : i32, i32
  }
}

</mosaic_0001>

<bundles_post_ra>
// kernel: mlp_forward.1
= control target key start
LH: loop header
LB: loop body
LE: loop exit
PB: predicated region body
PF: predicated region fallthrough
CT: control target
= control target key end

     0   :  { %vm81_vm0 = vcmask 1043456   ;;  %v698_v3 = vmov 0   ;;  %vm68_vm1 = vcmask 64512   ;;  %s931_s0 = inlined_call_operand.vmem [shape: bf16[8,256], index: 0, kind: input, shape index: {}]   ;;  %s932_s1 = inlined_call_operand.vmem [shape: bf16[64,8], index: 1, kind: input, shape index: {}]   ;;  %s933_s2 = inlined_call_operand.vmem [shape: f32[64,1], index: 2, kind: input, shape index: {}]   ;;  %s934_s3 = inlined_call_operand.vmem [shape: bf16[64,64], index: 3, kind: input, shape index: {}]   ;;  %s935_s4 = inlined_call_operand.vmem [shape: f32[64,1], index: 4, kind: input, shape index: {}]   ;;  %s936_s5 = inlined_call_operand.vmem [shape: bf16[64,64], index: 5, kind: input, shape index: {}]   ;;  %s937_s6 = inlined_call_operand.vmem [shape: f32[64,1], index: 6, kind: input, shape index: {}]   ;;  %s938_s7 = inlined_call_operand.vmem [shape: bf16[4,64], index: 7, kind: input, shape index: {}]   ;;  %s939_s8 = inlined_call_operand.vmem [shape: f32[4,1], index: 8, kind: input, shape index: {}]   ;;  %s940_s9 = inlined_call_operand.hbm [shape: f32[4,256], index: 9, kind: output, shape index: {}]  }
   0x1   :  { %v34_v0 = vld [vmem:[%s931_s0] sm:$0xff]  ;;  %120 = vmatprep.mubr.bf16.mxu0 %v698_v3  ;;  %140 = vmatprep.mubr.bf16.mxu1 %v698_v3  ;;  %v663_v6 = vld [vmem:[%s932_s1 + $0x10] sm:$0xff]   ;;  %v170_v8 = vld [vmem:[%s933_s2 + $0x8] sm:$0xff] }
   0x2   :  { %v631_v1 = vcombine.high %v34_v0, %v34_v0  ;;  %v630_v2 = vcombine.low %v34_v0, %v34_v0  ;;  %v662_v4 = vld [vmem:[%s932_s1] sm:$0xff]   ;;  %658 = vset.pattern.permute.xlu0 %v698_v3  ;;  %659 = vset.pattern.permute.xlu1 %v698_v3  ;;  %v171_v10 = vld [vmem:[%s933_s2 + $0x10] sm:$0xff]  ;;  %v172_v11 = vld [vmem:[%s933_s2 + $0x18] sm:$0xff] }
   0x3   :  { %v169_v7 = vld [vmem:[%s933_s2] sm:$0xff]  ;;  %v174_v13 = vld [vmem:[%s933_s2 + $0x28] sm:$0xff]  ;;  %v175_v15 = vld [vmem:[%s933_s2 + $0x30] sm:$0xff]  ;;  %v178_v17 = vpack.c.bf16 %v172_v11, %v171_v10 }
   0x4   :  { %632 = vmatprep.subr.msk.bf16.mxu0 %vm81_vm0, %v631_v1  ;;  %v83_v5 = vsel %vm81_vm0, %v630_v2, 0  ;;  %654 = vmatprep.subr.msk.bf16.mxu1 %vm81_vm0, %v631_v1  ;;  %v177_v9 = vpack.c.bf16 %v170_v8, %v169_v7  ;;  %v173_v12 = vld [vmem:[%s933_s2 + $0x20] sm:$0xff]  ;;  %v176_v16 = vld [vmem:[%s933_s2 + $0x38] sm:$0xff]  ;;  %v340_v20 = vld [vmem:[%s935_s4 + $0x8] sm:$0xff] }
   0x5   :  { %89 = vmatpush1.bf16.msra.mxu0 %v83_v5  ;;  %655 = vmatpush1.bf16.msra.mxu1 %v83_v5  ;;  %v179_v14 = vpack.c.bf16 %v174_v13, %v173_v12  ;;  %v339_v18 = vld [vmem:[%s935_s4] sm:$0xff]  ;;  %v180_v19 = vpack.c.bf16 %v176_v16, %v175_v15  ;;  %v341_v21 = vld [vmem:[%s935_s4 + $0x10] sm:$0xff]  ;;  %v342_v22 = vld [vmem:[%s935_s4 + $0x18] sm:$0xff] }
   0x6   :  { %183 = vperm.xlu0 %658, %v177_v9   ;;  %v664_v23 = vld [vmem:[%s932_s1 + $0x8] sm:$0xff]   ;;  %v665_v24 = vld [vmem:[%s932_s1 + $0x18] sm:$0xff]   ;;  %v343_v25 = vld [vmem:[%s935_s4 + $0x20] sm:$0xff]  ;;  %v347_v29 = vpack.c.bf16 %v340_v20, %v339_v18  ;;  %v348_v30 = vpack.c.bf16 %v342_v22, %v341_v21 }
   0x7   :  { %193 = vperm.xlu1 %659, %v179_v14   ;;  %v344_v26 = vld [vmem:[%s935_s4 + $0x28] sm:$0xff]  ;;  %v345_v27 = vld [vmem:[%s935_s4 + $0x30] sm:$0xff]  ;;  %v346_v28 = vld [vmem:[%s935_s4 + $0x38] sm:$0xff] }
   0x8   :  { %633 = vmatmul.mubr.msk.bf16.vlgmr.msra.gmra.mrb[0].mxu0 %vm68_vm1, %v662_v4  ;;  %635 = vmatmul.mubr.msk.bf16.vlgmr.msra.gmra.mrb[0].mxu1 %vm68_vm1, %v663_v6  ;;  %v508_v31 = vld [vmem:[%s937_s6] sm:$0xff]  ;;  %v509_v32 = vld [vmem:[%s937_s6 + $0x8] sm:$0xff]  ;;  %v349_v33 = vpack.c.bf16 %v344_v26, %v343_v25  ;;  %v350_v34 = vpack.c.bf16 %v346_v28, %v345_v27  ;;  %v510_v35 = vld [vmem:[%s937_s6 + $0x10] sm:$0xff] }
   0x9   :  { %130 = vmatprep.mubr.bf16.mxu0 %v698_v3  ;;  %150 = vmatprep.mubr.bf16.mxu1 %v698_v3  ;;  %v511_v36 = vld [vmem:[%s937_s6 + $0x18] sm:$0xff] }
   0xa   :  { %188 = vperm.xlu0 %658, %v178_v17  }
   0xb   :  { %198 = vperm.xlu1 %659, %v180_v19  }
   0xe   :  { %353 = vperm.xlu0 %658, %v347_v29  }
   0xf   :  { %358 = vperm.xlu1 %659, %v348_v30  }
  0x10   :  { %634 = vmatmul.mubr.msk.bf16.gmra.mrb[4].mxu0 %vm68_vm1, %v664_v23  ;;  %636 = vmatmul.mubr.msk.bf16.gmra.mrb[4].mxu1 %vm68_vm1, %v665_v24 }
  0x11   :  { %290 = vmatprep.mubr.bf16.mxu1 %v698_v3  ;;  %459 = vmatprep.mubr.bf16.mxu0 %v698_v3 }
  0x12   :  { %14 = vsyncpa [#allocation3], 0  ;;  %363 = vperm.xlu0 %658, %v349_v33   ;;  %v516_v37 = vpack.c.bf16 %v509_v32, %v508_v31  ;;  %v512_v38 = vld [vmem:[%s937_s6 + $0x20] sm:$0xff]  ;;  %v517_v39 = vpack.c.bf16 %v511_v36, %v510_v35  ;;  %v513_v40 = vld [vmem:[%s937_s6 + $0x28] sm:$0xff]  ;;  %vm245_vm2 = vcmask 523264   ;;  %s699_s11 = smov [#allocation2]  }
  0x13   :  { %368 = vperm.xlu1 %659, %v350_v34   ;;  %v514_v41 = vld [vmem:[%s937_s6 + $0x30] sm:$0xff]  ;;  %v515_v42 = vld [vmem:[%s937_s6 + $0x38] sm:$0xff]  ;;  %v518_v43 = vpack.c.bf16 %v513_v40, %v512_v38  ;;  %v557_v45 = vld [vmem:[%s939_s8] sm:$0xf]  ;;  %s618_s12 = sshll.u32 %s699_s11, 4  ;;  %s619_s12 = int_to_ptr.vmem [resolvable:$true] %s618_s12 }
  0x14   :  { %v519_v44 = vpack.c.bf16 %v515_v42, %v514_v41  ;;  %v666_v27 = vld [vmem:[%s934_s3] sm:$0xff]   ;;  %v667_v28 = vld [vmem:[%s934_s3 + $0x8] sm:$0xff]   ;;  %v668_v29 = vld [vmem:[%s934_s3 + $0x10] sm:$0xff]   ;;  %s674_s0 = scalar_lea.vmem %s619_s12, 128  ;;  %p679_p1 = scmp.lt.s32.totalorder %s619_s12, %s619_s12 }
  0x15   :  { %v669_v30 = vld [vmem:[%s934_s3 + $0x18] sm:$0xff]   ;;  %p675_p0 = scmp.ne.s32.totalorder %s619_s12, %s674_s0  ;;  %p680_p2 = scmp.lt.s32.totalorder %s674_s0, %s674_s0 }
  0x16   :  { %522 = vperm.xlu0 %658, %v516_v37  }
  0x17   :  { %527 = vperm.xlu1 %659, %v517_v39   ;;  %p681_p3 = por %p680_p2, %p679_p1 }
  0x19   :  { %p682_p4 = pnand %p681_p3, %p675_p0 }
  0x1a   :  { %532 = vperm.xlu0 %658, %v518_v43  }
  0x1b   :  { %537 = vperm.xlu1 %659, %v519_v44  }
  0x1e   :  { %560 = vperm.xlu0 %658, %v557_v45  }
  0x85   :  { %v184_v56 = vpop.permute.xlu0 %183 }
  0x86   :  { %v194_v61 = vpop.permute.xlu1 %193 }
  0x89   :  { %v189_v11 = vpop.permute.xlu0 %188 }
  0x8a   :  { %v199_v18 = vpop.permute.xlu1 %198 }
  0x8d   :  { %v354_v36 = vpop.permute.xlu0 %353 }
  0xdb   :  { %v122_v46 = vpop.f32.mrb[0].mxu0  ;;  %v142_v47 = vpop.f32.mrb[0].mxu1 }
  0xdc   :  { %v124_v48 = vpop.f32.mrb[1].mxu0  ;;  %v144_v49 = vpop.f32.mrb[1].mxu1 }
  0xdd   :  { %v126_v50 = vpop.f32.mrb[2].mxu0  ;;  %v146_v51 = vpop.f32.mrb[2].mxu1 }
  0xde   :  { %v161_v52 = vpack.c.bf16 %v126_v50, %v122_v46  ;;  %v128_v53 = vpop.f32.mrb[3].mxu0  ;;  %v165_v54 = vpack.c.bf16 %v146_v51, %v142_v47  ;;  %v148_v55 = vpop.f32.mrb[3].mxu1 }
  0xdf   :  { %v162_v57 = vpack.c.bf16 %v128_v53, %v124_v48  ;;  %v166_v58 = vpack.c.bf16 %v148_v55, %v144_v49  ;;  %v359_v47 = vpop.permute.xlu1 %358 }
  0xe0   :  { %v201_v59 = vadd.bf16 %v184_v56, %v161_v52  ;;  %v205_v19 = vadd.bf16 %v194_v61, %v165_v54 }
  0xe1   :  { %v202_v60 = vadd.bf16 %v184_v56, %v162_v57  ;;  %v206_v15 = vadd.bf16 %v194_v61, %v166_v58  ;;  %v364_v58 = vpop.permute.xlu0 %363 }
  0xe2   :  { %v209_v1 = vmax.bf16 %v698_v3, %v201_v59  ;;  %v213_v23 = vmax.bf16 %v698_v3, %v205_v19 }
  0xe3   :  { %v132_v62 = vpop.f32.mrb[4].mxu0  ;;  %v210_v63 = vmax.bf16 %v698_v3, %v202_v60  ;;  %v152_v0 = vpop.f32.mrb[4].mxu1  ;;  %v214_v22 = vmax.bf16 %v698_v3, %v206_v15  ;;  %v673_v15 = vld [vmem:[%s936_s5 + $0x18] sm:$0xff]  }
  0xe4   :  { %v134_v2 = vpop.f32.mrb[5].mxu0  ;;  %v154_v4 = vpop.f32.mrb[5].mxu1 }
  0xe5   :  { %v136_v5 = vpop.f32.mrb[6].mxu0  ;;  %258 = vmatprep.subr.bf16.mxu1 %v210_v63  ;;  %v156_v6 = vpop.f32.mrb[6].mxu1 }
  0xe6   :  { %v163_v7 = vpack.c.bf16 %v136_v5, %v132_v62  ;;  %v138_v8 = vpop.f32.mrb[7].mxu0  ;;  %259 = vmatpush1.bf16.msra.mxu1 %v209_v1  ;;  %v167_v9 = vpack.c.bf16 %v156_v6, %v152_v0  ;;  %v158_v10 = vpop.f32.mrb[7].mxu1 }
  0xe7   :  { %v164_v12 = vpack.c.bf16 %v138_v8, %v134_v2  ;;  %v168_v13 = vpack.c.bf16 %v158_v10, %v154_v4  ;;  %v369_v6 = vpop.permute.xlu1 %368 }
  0xe8   :  { %v203_v14 = vadd.bf16 %v189_v11, %v163_v7  ;;  %v207_v24 = vadd.bf16 %v199_v18, %v167_v9 }
  0xe9   :  { %v204_v16 = vadd.bf16 %v189_v11, %v164_v12  ;;  %v208_v21 = vadd.bf16 %v199_v18, %v168_v13  ;;  %v670_v12 = vld [vmem:[%s936_s5] sm:$0xff]   ;;  %v671_v13 = vld [vmem:[%s936_s5 + $0x8] sm:$0xff]  }
  0xea   :  { %v211_v20 = vmax.bf16 %v698_v3, %v203_v14  ;;  %v215_v26 = vmax.bf16 %v698_v3, %v207_v24  ;;  %v672_v14 = vld [vmem:[%s936_s5 + $0x10] sm:$0xff]  }
  0xeb   :  { %v212_v17 = vmax.bf16 %v698_v3, %v204_v16  ;;  %v216_v25 = vmax.bf16 %v698_v3, %v208_v21  ;;  %v523_v21 = vpop.permute.xlu0 %522 }
  0xed   :  { %260 = vmatprep.subr.bf16.mxu1 %v212_v17 }
  0xee   :  { %261 = vmatpush1.bf16.msra.mxu1 %v211_v20 }
  0xef   :  { %262 = vmatprep.subr.bf16.mxu1 %v214_v22 }
  0xf2   :  { %263 = vmatpush1.bf16.msra.mxu1 %v213_v23 }
  0xf3   :  { %264 = vmatprep.subr.bf16.mxu1 %v216_v25 }
  0xf6   :  { %265 = vmatpush1.bf16.msra.mxu1 %v215_v26 }
  0xf9   :  { %641 = vmatmul.mubr.msk.bf16.vlgmr.msra.gmra.mrb[8].mxu1 %vm245_vm2, %v666_v27 }
  0xfa   :  { %300 = vmatprep.mubr.bf16.mxu1 %v698_v3 }
 0x101   :  { %642 = vmatmul.mubr.msk.bf16.gmra.mrb[12].mxu1 %vm245_vm2, %v667_v28 }
 0x102   :  { %310 = vmatprep.mubr.bf16.mxu1 %v698_v3 }
 0x109   :  { %643 = vmatmul.mubr.msk.bf16.gmra.mrb[16].mxu1 %vm245_vm2, %v668_v29 }
 0x10a   :  { %320 = vmatprep.mubr.bf16.mxu1 %v698_v3 }
 0x111   :  { %644 = vmatmul.mubr.msk.bf16.gmra.mrb[20].mxu1 %vm245_vm2, %v669_v30 }
 0x112   :  { %598 = vmatprep.mubr.bf16.mxu1 %v698_v3 }
 0x1cc   :  { %v292_v31 = vpop.f32.mrb[8].mxu1 }
 0x1cd   :  { %v294_v32 = vpop.f32.mrb[9].mxu1 }
 0x1ce   :  { %v296_v33 = vpop.f32.mrb[10].mxu1 }
 0x1cf   :  { %v331_v34 = vpack.c.bf16 %v296_v33, %v292_v31  ;;  %v298_v35 = vpop.f32.mrb[11].mxu1 }
 0x1d0   :  { %v332_v37 = vpack.c.bf16 %v298_v35, %v294_v32  ;;  %v528_v32 = vpop.permute.xlu1 %527 }
 0x1d1   :  { %v371_v38 = vadd.bf16 %v354_v36, %v331_v34 }
 0x1d2   :  { %v372_v39 = vadd.bf16 %v354_v36, %v332_v37 }
 0x1d3   :  { %v379_v42 = vmax.bf16 %v698_v3, %v371_v38 }
 0x1d4   :  { %v302_v40 = vpop.f32.mrb[12].mxu1  ;;  %v380_v41 = vmax.bf16 %v698_v3, %v372_v39 }
 0x1d5   :  { %v304_v43 = vpop.f32.mrb[13].mxu1 }
 0x1d6   :  { %v306_v44 = vpop.f32.mrb[14].mxu1  ;;  %427 = vmatprep.subr.bf16.mxu0 %v380_v41 }
 0x1d7   :  { %v333_v45 = vpack.c.bf16 %v306_v44, %v302_v40  ;;  %v308_v46 = vpop.f32.mrb[15].mxu1  ;;  %428 = vmatpush1.bf16.msra.mxu0 %v379_v42 }
 0x1d8   :  { %v334_v48 = vpack.c.bf16 %v308_v46, %v304_v43  ;;  %v533_v43 = vpop.permute.xlu0 %532 }
 0x1d9   :  { %v373_v49 = vadd.bf16 %v359_v47, %v333_v45 }
 0x1da   :  { %v374_v50 = vadd.bf16 %v359_v47, %v334_v48 }
 0x1db   :  { %v381_v53 = vmax.bf16 %v698_v3, %v373_v49 }
 0x1dc   :  { %v312_v51 = vpop.f32.mrb[16].mxu1  ;;  %v382_v52 = vmax.bf16 %v698_v3, %v374_v50 }
 0x1dd   :  { %v314_v54 = vpop.f32.mrb[17].mxu1 }
 0x1de   :  { %v316_v55 = vpop.f32.mrb[18].mxu1  ;;  %429 = vmatprep.subr.bf16.mxu0 %v382_v52 }
 0x1df   :  { %v335_v56 = vpack.c.bf16 %v316_v55, %v312_v51  ;;  %v318_v57 = vpop.f32.mrb[19].mxu1  ;;  %430 = vmatpush1.bf16.msra.mxu0 %v381_v53 }
 0x1e0   :  { %v336_v59 = vpack.c.bf16 %v318_v57, %v314_v54  ;;  %v538_v54 = vpop.permute.xlu1 %537 }
 0x1e1   :  { %v375_v60 = vadd.bf16 %v364_v58, %v335_v56 }
 0x1e2   :  { %v376_v61 = vadd.bf16 %v364_v58, %v336_v59 }
 0x1e3   :  { %v383_v0 = vmax.bf16 %v698_v3, %v375_v60  ;;  %v556_v60 = vld [vmem:[%s938_s7] sm:$0x3] }
 0x1e4   :  { %v322_v62 = vpop.f32.mrb[20].mxu1  ;;  %v384_v63 = vmax.bf16 %v698_v3, %v376_v61  ;;  %v561_v61 = vpop.permute.xlu0 %560 }
 0x1e5   :  { %v324_v1 = vpop.f32.mrb[21].mxu1 }
 0x1e6   :  { %v326_v2 = vpop.f32.mrb[22].mxu1  ;;  %431 = vmatprep.subr.bf16.mxu0 %v384_v63 }
 0x1e7   :  { %v337_v4 = vpack.c.bf16 %v326_v2, %v322_v62  ;;  %v328_v5 = vpop.f32.mrb[23].mxu1  ;;  %432 = vmatpush1.bf16.msra.mxu0 %v383_v0 }
 0x1e8   :  { %v338_v7 = vpack.c.bf16 %v328_v5, %v324_v1 }
 0x1e9   :  { %v377_v8 = vadd.bf16 %v369_v6, %v337_v4 }
 0x1ea   :  { %v378_v9 = vadd.bf16 %v369_v6, %v338_v7 }
 0x1eb   :  { %v385_v11 = vmax.bf16 %v698_v3, %v377_v8 }
 0x1ec   :  { %v386_v10 = vmax.bf16 %v698_v3, %v378_v9 }
 0x1ee   :  { %433 = vmatprep.subr.bf16.mxu0 %v386_v10 }
 0x1ef   :  { %434 = vmatpush1.bf16.msra.mxu0 %v385_v11 }
 0x1f2   :  { %649 = vmatmul.mubr.msk.bf16.vlgmr.msra.gmra.mrb[8].mxu0 %vm245_vm2, %v670_v12 }
 0x1f3   :  { %469 = vmatprep.mubr.bf16.mxu0 %v698_v3 }
 0x1fa   :  { %650 = vmatmul.mubr.msk.bf16.gmra.mrb[12].mxu0 %vm245_vm2, %v671_v13 }
 0x1fb   :  { %479 = vmatprep.mubr.bf16.mxu0 %v698_v3 }
 0x202   :  { %651 = vmatmul.mubr.msk.bf16.gmra.mrb[16].mxu0 %vm245_vm2, %v672_v14 }
 0x203   :  { %489 = vmatprep.mubr.bf16.mxu0 %v698_v3 }
 0x20a   :  { %652 = vmatmul.mubr.msk.bf16.gmra.mrb[20].mxu0 %vm245_vm2, %v673_v15 }
 0x2c5   :  { %v461_v16 = vpop.f32.mrb[8].mxu0 }
 0x2c6   :  { %v463_v17 = vpop.f32.mrb[9].mxu0 }
 0x2c7   :  { %v465_v18 = vpop.f32.mrb[10].mxu0 }
 0x2c8   :  { %v500_v19 = vpack.c.bf16 %v465_v18, %v461_v16  ;;  %v467_v20 = vpop.f32.mrb[11].mxu0 }
 0x2c9   :  { %v501_v22 = vpack.c.bf16 %v467_v20, %v463_v17 }
 0x2ca   :  { %v540_v23 = vadd.bf16 %v523_v21, %v500_v19 }
 0x2cb   :  { %v541_v24 = vadd.bf16 %v523_v21, %v501_v22 }
 0x2cc   :  { %v548_v27 = vmax.bf16 %v698_v3, %v540_v23 }
 0x2cd   :  { %v471_v25 = vpop.f32.mrb[12].mxu0  ;;  %v549_v26 = vmax.bf16 %v698_v3, %v541_v24 }
 0x2ce   :  { %v473_v28 = vpop.f32.mrb[13].mxu0 }
 0x2cf   :  { %v475_v29 = vpop.f32.mrb[14].mxu0  ;;  %566 = vmatprep.subr.bf16.mxu1 %v549_v26 }
 0x2d0   :  { %v502_v30 = vpack.c.bf16 %v475_v29, %v471_v25  ;;  %v477_v31 = vpop.f32.mrb[15].mxu0  ;;  %567 = vmatpush1.bf16.msra.mxu1 %v548_v27 }
 0x2d1   :  { %v503_v33 = vpack.c.bf16 %v477_v31, %v473_v28 }
 0x2d2   :  { %v542_v34 = vadd.bf16 %v528_v32, %v502_v30 }
 0x2d3   :  { %v543_v35 = vadd.bf16 %v528_v32, %v503_v33 }
 0x2d4   :  { %v550_v38 = vmax.bf16 %v698_v3, %v542_v34 }
 0x2d5   :  { %v481_v36 = vpop.f32.mrb[16].mxu0  ;;  %v551_v37 = vmax.bf16 %v698_v3, %v543_v35 }
 0x2d6   :  { %v483_v39 = vpop.f32.mrb[17].mxu0 }
 0x2d7   :  { %v485_v40 = vpop.f32.mrb[18].mxu0  ;;  %568 = vmatprep.subr.bf16.mxu1 %v551_v37 }
 0x2d8   :  { %v504_v41 = vpack.c.bf16 %v485_v40, %v481_v36  ;;  %v487_v42 = vpop.f32.mrb[19].mxu0  ;;  %569 = vmatpush1.bf16.msra.mxu1 %v550_v38 }
 0x2d9   :  { %v505_v44 = vpack.c.bf16 %v487_v42, %v483_v39 }
 0x2da   :  { %v544_v45 = vadd.bf16 %v533_v43, %v504_v41 }
 0x2db   :  { %v545_v46 = vadd.bf16 %v533_v43, %v505_v44 }
 0x2dc   :  { %v552_v49 = vmax.bf16 %v698_v3, %v544_v45 }
 0x2dd   :  { %v491_v47 = vpop.f32.mrb[20].mxu0  ;;  %v553_v48 = vmax.bf16 %v698_v3, %v545_v46 }
 0x2de   :  { %v493_v50 = vpop.f32.mrb[21].mxu0 }
 0x2df   :  { %v495_v51 = vpop.f32.mrb[22].mxu0  ;;  %570 = vmatprep.subr.bf16.mxu1 %v553_v48 }
 0x2e0   :  { %v506_v52 = vpack.c.bf16 %v495_v51, %v491_v47  ;;  %v497_v53 = vpop.f32.mrb[23].mxu0  ;;  %571 = vmatpush1.bf16.msra.mxu1 %v552_v49 }
 0x2e1   :  { %v507_v55 = vpack.c.bf16 %v497_v53, %v493_v50 }
 0x2e2   :  { %v546_v56 = vadd.bf16 %v538_v54, %v506_v52 }
 0x2e3   :  { %v547_v57 = vadd.bf16 %v538_v54, %v507_v55 }
 0x2e4   :  { %v554_v59 = vmax.bf16 %v698_v3, %v546_v56 }
 0x2e5   :  { %v555_v58 = vmax.bf16 %v698_v3, %v547_v57 }
 0x2e7   :  { %572 = vmatprep.subr.bf16.mxu1 %v555_v58 }
 0x2e8   :  { %573 = vmatpush1.bf16.msra.mxu1 %v554_v59 }
 0x2eb   :  { %653 = vmatmul.mubr.msk.bf16.vlgmr.msra.gmra.mrb[24].mxu1 %vm245_vm2, %v556_v60 }
 0x3be   :  { %v600_v62 = vpop.f32.mrb[24].mxu1 }
 0x3bf   :  { %v601_v63 = vadd.f32 %v600_v62, %v561_v61  ;;  %v602_v0 = vpop.f32.mrb[25].mxu1 }
 0x3c0   :  { %v603_v1 = vadd.f32 %v602_v0, %v561_v61  ;;  %v604_v2 = vpop.f32.mrb[26].mxu1 }
 0x3c1   :  { %v605_v4 = vpop.f32.mrb[27].mxu1 }
 0x3c2   :  { %v609_v5 = vcombine.low %v601_v63, %v603_v1 }
 0x3c4   :  { %611 = vst [vmem:[#allocation2] sm:$0xff] %v609_v5 }
 0x3c5   :  { %685 = shalt.err (!%p682_p4)
}
 0x3c6   :  { %s686_s14 = scalar_lea.hbm %s940_s9, 128 }
 0x3c7   :  { %p687_p5 = scmp.ne.s32.totalorder %s940_s9, %s686_s14  ;;  %p690_p6 = scmp.lt.u32.totalorder %s686_s14, %s940_s9 }
 0x3c9   :  { %p692_p7 = pnand %p690_p6, %p687_p5 }
 0x3cb   :  { %695 = shalt.err (!%p692_p7)
}
 0x3cc   :  { %621 = dma.vmem_to_hbm [thread:$0]  %s619_s12, 128, %s940_s9, [#allocation3]  }
 0x3cd   :  { %696 = dma.done.wait [#allocation3], 128  }
 0x3ce   :  { %697 = vsyncadd [#allocation3], 4294967168 }
 0x3cf   :  { %625 = vsyncpa [#allocation3], 1 }

</bundles_post_ra>
